<compile_context>
chip_gen: v6e
topology: v6e:2x2x1
jax: 0.10.0
libtpu: 0.0.40
codegen_flags: <defaults>
</compile_context>

<pallas_src>
import jax
import jax.numpy as jnp
from jax.experimental import pallas as pl
from jax.experimental.pallas import tpu as pltpu


def _group_linear_kernel(x_ref, w_ref, b_ref, o_ref):
    # x_ref : (b_blk, g_blk*in)          activations, original channel layout
    # w_ref : (1, g_blk*in, g_blk*out)   block-diagonal weight chunk
    # b_ref : (1, g_blk*out)             effective bias chunk (bias + fold(bias_first))
    # o_ref : (b_blk, g_blk*out)
    acc = jnp.dot(x_ref[...], w_ref[0], preferred_element_type=jnp.float32)
    o_ref[...] = (acc + b_ref[...]).astype(o_ref.dtype)


def _choose_group_block(n_features, in_features, out_features, target=512):
    """Groups per grid step.

    Single chunk when the dense block-diagonal weight is already small;
    otherwise the largest divisor of n_features whose per-chunk (g*in, g*out)
    tile is 128-lane aligned and <= target.
    """
    if n_features * in_features <= target and n_features * out_features <= target:
        return n_features
    for g in range(n_features, 0, -1):
        if n_features % g:
            continue
        gk, gn = g * in_features, g * out_features
        if gk <= target and gn <= target and gk % 128 == 0 and gn % 128 == 0:
            return g
    # TODO(synk): in/out_features not 128-alignable by grouping; fall back to the
    # full block-diagonal weight (O(n^2) zeros) rather than mis-tile the lanes.
    return n_features


def group_linear(x, w, bias_first, bias, *, in_features, out_features, n_features,
                 b_blk=None, g_blk=None):
    """x: (B, in_features * n_features) -> (B, out_features * n_features)

    w          : (n_features, in_features, out_features)
    bias_first : (1, in_features * n_features)  or None
    bias       : (1, out_features * n_features) or None
    Channel layouts match the PyTorch module (c_in = g*in + i, c_out = g*out + o).
    """
    B = x.shape[0]
    K = in_features * n_features
    N = out_features * n_features
    f32 = jnp.float32
    assert x.shape == (B, K)

    if g_blk is None:
        g_blk = _choose_group_block(n_features, in_features, out_features)
    assert n_features % g_blk == 0, (n_features, g_blk)
    n_chunks = n_features // g_blk
    gk = g_blk * in_features
    gn = g_blk * out_features
    if n_chunks > 1:
        # (8,128) tiling rule: chunked column slabs must be lane-aligned.
        assert gk % 128 == 0 and gn % 128 == 0, (gk, gn)

    # --- one-time parameter packing (plain JAX) -------------------------------
    # Per-chunk block-diagonal weight:
    #   w_chunks[c, g*in+i, h*out+o] = w[c*g_blk+g, i, o] * delta(g, h)
    w4 = w.reshape(n_chunks, g_blk, in_features, out_features)
    eye = jnp.eye(g_blk, dtype=w.dtype)
    w_chunks = (w4[:, :, :, None, :] * eye[None, :, None, :, None]
                ).reshape(n_chunks, gk, gn)

    # Fold the input-side bias into the output bias (per group, in f32):
    #   (x + bf) @ W + b  ==  x @ W + (einsum(bf, W) + b)
    if bias is None:
        b_eff = jnp.zeros((1, N), dtype=f32)
    else:
        b_eff = bias.astype(f32).reshape(1, N)
    if bias_first is not None:
        bf = bias_first.astype(f32).reshape(n_features, in_features)
        fold = jnp.einsum("gi,gio->go", bf, w.astype(f32),
                          preferred_element_type=f32).reshape(1, N)
        b_eff = b_eff + fold

    # --- batch tiling ----------------------------------------------------------
    if b_blk is None:
        b_blk = B if B <= 512 else 512   # ==B (always legal) or /8-aligned
    grid = (pl.cdiv(B, b_blk), n_chunks)

    out = pl.pallas_call(
        _group_linear_kernel,
        out_shape=jax.ShapeDtypeStruct((B, N), x.dtype),
        grid_spec=pltpu.PrefetchScalarGridSpec(
            num_scalar_prefetch=0,
            grid=grid,
            in_specs=[
                pl.BlockSpec((b_blk, gk), lambda i, g: (i, g)),
                pl.BlockSpec((1, gk, gn), lambda i, g: (g, 0, 0)),
                pl.BlockSpec((1, gn), lambda i, g: (0, g)),
            ],
            out_specs=pl.BlockSpec((b_blk, gn), lambda i, g: (i, g)),
        ),
        compiler_params=pltpu.CompilerParams(
            dimension_semantics=("parallel", "parallel"),
        ),
    )(x, w_chunks, b_eff)
    return out


def _reference(x, w, bias_first, bias, *, in_features, out_features, n_features):
    """Pure-JAX mirror of the PyTorch forward (bias_first add, grouped conv, bias)."""
    B = x.shape[0]
    if bias_first is not None:
        x = x + bias_first
    xr = x.reshape(B, n_features, in_features)
    y = jnp.einsum("bgi,gio->bgo", xr, w).reshape(B, out_features * n_features)
    if bias is not None:
        y = y + bias
    return y


if __name__ == "__main__":
    key = jax.random.PRNGKey(0)

    # --- Test 1: module demo config (bias + bias_first), single-chunk path ----
    in_f, out_f, n_f, B = 8, 16, 4, 2
    K, N = in_f * n_f, out_f * n_f
    key, kx, kw, kbf, kb = jax.random.split(key, 5)
    x = jax.random.normal(kx, (B, K), dtype=jnp.float32)
    # Conv1d weight (out*n, in, 1) expressed as (n, in, out): w[g,i,o] = W_conv[g*out+o, i, 0].
    w = jax.random.normal(kw, (n_f, in_f, out_f), dtype=jnp.float32) * 0.1
    bias_first = 0.1 * jax.random.truncated_normal(kbf, -2.0, 2.0, (1, K), dtype=jnp.float32)
    bias = 0.1 * jax.random.truncated_normal(kb, -2.0, 2.0, (1, N), dtype=jnp.float32)

    y = jax.block_until_ready(group_linear(
        x, w, bias_first, bias,
        in_features=in_f, out_features=out_f, n_features=n_f))
    ref = _reference(x, w, bias_first, bias,
                     in_features=in_f, out_features=out_f, n_features=n_f)
    assert y.shape == (B, N)
    assert jnp.allclose(y, ref, atol=1e-4, rtol=1e-4), float(jnp.max(jnp.abs(y - ref)))

    # --- Test 2: multi-chunk path (2 group chunks, 128-lane-aligned slabs) ----
    in_f2, out_f2, n_f2, B2 = 32, 64, 8, 16
    K2, N2 = in_f2 * n_f2, out_f2 * n_f2
    key, kx2, kw2, kb2 = jax.random.split(key, 4)
    x2 = jax.random.normal(kx2, (B2, K2), dtype=jnp.float32)
    w2 = jax.random.normal(kw2, (n_f2, in_f2, out_f2), dtype=jnp.float32) * 0.05
    bias2 = 0.1 * jax.random.truncated_normal(kb2, -2.0, 2.0, (1, N2), dtype=jnp.float32)

    y2 = jax.block_until_ready(group_linear(
        x2, w2, None, bias2,
        in_features=in_f2, out_features=out_f2, n_features=n_f2, g_blk=4))
    ref2 = _reference(x2, w2, None, bias2,
                      in_features=in_f2, out_features=out_f2, n_features=n_f2)
    assert y2.shape == (B2, N2)
    assert jnp.allclose(y2, ref2, atol=1e-4, rtol=1e-4), float(jnp.max(jnp.abs(y2 - ref2)))

    print("KERNEL_OK")
</pallas_src>

<mosaic_0001>
module attributes {stable_mosaic.version = 11 : i64} {
  func.func @_group_linear_kernel(%arg0: i32, %arg1: i32, %arg2: memref<2x32xf32, #tpu.memory_space<vmem>>, %arg3: memref<1x32x64xf32, #tpu.memory_space<vmem>>, %arg4: memref<1x64xf32, #tpu.memory_space<vmem>>, %arg5: memref<2x64xf32, #tpu.memory_space<vmem>>) attributes {dimension_semantics = [#tpu.dimension_semantics<parallel>, #tpu.dimension_semantics<parallel>], iteration_bounds = array<i64: 1, 1>, scalar_prefetch = 0 : i64, scratch_operands = 0 : i64, tpu.core_type = #tpu.core_type<tc>, window_params = [{transform_indices = @transform_0, window_bounds = array<i64: 2, 32>}, {transform_indices = @transform_1, window_bounds = array<i64: 1, 32, 64>}, {transform_indices = @transform_2, window_bounds = array<i64: 1, 64>}, {transform_indices = @transform_3, window_bounds = array<i64: 2, 64>}]} {
    %c0 = arith.constant 0 : index
    %c0_0 = arith.constant 0 : index
    %0 = vector.load %arg2[%c0, %c0_0] : memref<2x32xf32, #tpu.memory_space<vmem>>, vector<2x32xf32>
    %c0_1 = arith.constant 0 : index
    %c0_2 = arith.constant 0 : index
    %c0_3 = arith.constant 0 : index
    %1 = vector.load %arg3[%c0_1, %c0_2, %c0_3] : memref<1x32x64xf32, #tpu.memory_space<vmem>>, vector<1x32x64xf32>
    %2 = vector.shape_cast %1 : vector<1x32x64xf32> to vector<32x64xf32>
    %cst = arith.constant dense<0.000000e+00> : vector<2x64xf32>
    %3 = tpu.matmul %0, %2, %cst {dimension_numbers = #tpu.dot_dimension_numbers<[1], [0], [0], [1], [0, 0, 1, 1], [], []>} : vector<2x32xf32>, vector<32x64xf32>, vector<2x64xf32> -> vector<2x64xf32>
    %c0_4 = arith.constant 0 : index
    %c0_5 = arith.constant 0 : index
    %4 = vector.load %arg4[%c0_4, %c0_5] : memref<1x64xf32, #tpu.memory_space<vmem>>, vector<1x64xf32>
    %5 = vector.broadcast %4 : vector<1x64xf32> to vector<2x64xf32>
    %6 = arith.addf %3, %5 : vector<2x64xf32>
    %c0_6 = arith.constant 0 : index
    %c0_7 = arith.constant 0 : index
    %7 = vector.load %arg5[%c0_6, %c0_7] : memref<2x64xf32, #tpu.memory_space<vmem>>, vector<2x64xf32>
    tpu.vector_store %arg5[%c0_6, %c0_7], %6 {strides = array<i32>} : memref<2x64xf32, #tpu.memory_space<vmem>>, vector<2x64xf32>,
    return
  }
  func.func @transform_0(%arg0: i32, %arg1: i32) -> (i32, i32) {
    %c0_i32 = arith.constant 0 : i32
    return %arg0, %arg1 : i32, i32
  }
  func.func @transform_1(%arg0: i32, %arg1: i32) -> (i32, i32, i32) {
    %c0_i32 = arith.constant 0 : i32
    %c0_i32_0 = arith.constant 0 : i32
    %c0_i32_1 = arith.constant 0 : i32
    return %arg1, %c0_i32, %c0_i32_0 : i32, i32, i32
  }
  func.func @transform_2(%arg0: i32, %arg1: i32) -> (i32, i32) {
    %c0_i32 = arith.constant 0 : i32
    %c0_i32_0 = arith.constant 0 : i32
    return %c0_i32, %arg1 : i32, i32
  }
  func.func @transform_3(%arg0: i32, %arg1: i32) -> (i32, i32) {
    %c0_i32 = arith.constant 0 : i32
    return %arg0, %arg1 : i32, i32
  }
}

</mosaic_0001>

<bundles_post_ra>
// kernel: tpu_custom_call.1
= control target key start
LH: loop header
LB: loop body
LE: loop exit
PB: predicated region body
PF: predicated region fallthrough
CT: control target
= control target key end

     0   :  { %8 = vsyncpa [#allocation3], 0  ;;  %s275_s0 = inlined_call_operand.hbm [shape: f32[2,32], index: 0, kind: input, shape index: {}]   ;;  %s276_s1 = inlined_call_operand.hbm [shape: f32[1,32,64], index: 1, kind: input, shape index: {}]   ;;  %s277_s2 = inlined_call_operand.vmem [shape: f32[1,64], index: 2, kind: input, shape index: {}]   ;;  %s278_s3 = inlined_call_operand.hbm [shape: f32[2,64], index: 3, kind: output, shape index: {}]  }
   0x1   :  { %9 = vsyncpa [#allocation6], 0 }
   0x2   :  { %10 = vsyncpa [#allocation4], 0  ;;  %s236_s12 = smov [#allocation2]   ;;  %s237_s14 = smov [#allocation5]  }
   0x3   :  { %s17_s13 = sshll.u32 %s236_s12, 4  ;;  %s26_s15 = sshll.u32 %s237_s14, 4  ;;  %s18_s13 = int_to_ptr.vmem [resolvable:$true] %s17_s13  ;;  %s27_s15 = int_to_ptr.vmem [resolvable:$true] %s26_s15 }
   0x4   :  { %s178_s16 = scalar_lea.vmem %s18_s13, 32  ;;  %p183_p1 = scmp.lt.s32.totalorder %s18_s13, %s18_s13 }
   0x5   :  { %p179_p0 = scmp.ne.s32.totalorder %s18_s13, %s178_s16  ;;  %p184_p2 = scmp.lt.s32.totalorder %s178_s16, %s178_s16 }
   0x7   :  { %p185_p3 = por %p184_p2, %p183_p1 }
   0x9   :  { %p186_p4 = pnand %p185_p3, %p179_p0 }
   0xb   :  { %189 = shalt.err (!%p186_p4)
}
   0xc   :  { %20 = dma.hbm_to_vmem [thread:$0]  %s275_s0, 32, %s18_s13, [#allocation3]  }
   0xd   :  { %s198_s19 = scalar_lea.vmem %s27_s15, 512  ;;  %p203_p6 = scmp.lt.s32.totalorder %s27_s15, %s27_s15 }
   0xe   :  { %p199_p5 = scmp.ne.s32.totalorder %s27_s15, %s198_s19  ;;  %p204_p7 = scmp.lt.s32.totalorder %s198_s19, %s198_s19 }
  0x10   :  { %p205_p8 = por %p204_p7, %p203_p6 }
  0x12   :  { %p206_p9 = pnand %p205_p8, %p199_p5 }
  0x14   :  { %209 = shalt.err (!%p206_p9)
}
  0x15   :  { %s238_s20 = smov 128   ;;  %s239_s21 = smov 8  }
  0x16   :  { %32 = dma.hbm_to_vmem [thread:$0]  %s276_s1, 512, %s27_s15, [#allocation6], %s238_s20, %s238_s20, %s239_s21  }
  0x17   :  { %230 = dma.done.wait [#allocation3], 32  }
  0x18   :  { %231 = vsyncadd [#allocation3], 4294967264 }
  0x19   :  { %232 = dma.done.wait [#allocation6], 512  }
  0x1a   :  { %233 = vsyncadd [#allocation6], 4294966784  ;;  %v240_v0 = vmov 0.0   ;;  %vm241_vm0 = vmmov 0   ;;  %v45_v1 = vld [vmem:[#allocation5 + $0x18] sm:$0xff]  ;;  %v44_v2 = vld [vmem:[#allocation5 + $0x10] sm:$0xff] }
  0x1b   :  { %152 = vmatprep.subr.mxu0 %v240_v0  ;;  %160 = vmatprep.mubr.msk.f32.mxu0 %vm241_vm0, %v240_v0  ;;  %v43_v3 = vld [vmem:[#allocation5 + $0x8] sm:$0xff]  ;;  %v42_v4 = vld [vmem:[#allocation5] sm:$0xff]  ;;  %v41_v5 = vld [vmem:[#allocation2] sm:$0x3]  ;;  %vm53_vm1 = vcmask 261120   ;;  %s242_s24 = smov [#allocation7]  }
  0x1c   :  { %153 = vmatpush3.msra.mxu0 %v45_v1  ;;  %v145_v6 = vld [vmem:[%s277_s2] ss:$0 sm:$0xff]  ;;  %s135_s25 = sshll.u32 %s242_s24, 4  ;;  %vm127_vm2 = vcmask 517120   ;;  %s136_s25 = int_to_ptr.vmem [resolvable:$true] %s135_s25 }
  0x1d   :  { %154 = vmatprep.subr.mxu0 %v240_v0  ;;  %s210_s26 = scalar_lea.vmem %s136_s25, 32  ;;  %p215_p11 = scmp.lt.s32.totalorder %s136_s25, %s136_s25 }
  0x1e   :  { %155 = vmatpush3.msra.mxu0 %v44_v2  ;;  %p211_p10 = scmp.ne.s32.totalorder %s136_s25, %s210_s26  ;;  %p216_p12 = scmp.lt.s32.totalorder %s210_s26, %s210_s26 }
  0x1f   :  { %156 = vmatprep.subr.mxu0 %v240_v0 }
  0x20   :  { %157 = vmatpush3.msra.mxu0 %v43_v3  ;;  %p217_p13 = por %p216_p12, %p215_p11 }
  0x21   :  { %158 = vmatprep.subr.mxu0 %v240_v0 }
  0x22   :  { %159 = vmatpush3.msra.mxu0 %v42_v4  ;;  %p218_p0 = pnand %p217_p13, %p211_p10 }
  0x23   :  { %161 = vmatmul.mubr.msk.f32.vlgmr.msra.gmra.mxu0 %vm53_vm1, %v41_v5 }
  0xe3   :  { %v123_v7 = vpop.f32.mrf.mxu0 }
  0xe4   :  { %v124_v8 = vadd.f32 %v145_v6, %v123_v7 }
  0xe5   :  { %v162_v9 = vpop.f32.mrf.mxu0 }
  0xe6   :  { %128 = vst.msk [vmem:[#allocation7] sm:$0x3] %vm127_vm2, %v124_v8 }
  0xe7   :  { %221 = shalt.err (!%p218_p0)
}
  0xe8   :  { %138 = dma.vmem_to_hbm [thread:$0]  %s136_s25, 32, %s278_s3, [#allocation4]  }
  0xe9   :  { %234 = dma.done.wait [#allocation4], 32  }
  0xea   :  { %235 = vsyncadd [#allocation4], 4294967264 }
  0xeb   :  { %142 = vsyncpa [#allocation3], 1 }
  0xec   :  { %143 = vsyncpa [#allocation6], 1 }
  0xed   :  { %144 = vsyncpa [#allocation4], 1 }

</bundles_post_ra>
